<compile_context>
chip_gen: v7x
topology: tpu7x:2x2x1
jax: 0.10.0
libtpu: 0.0.40
codegen_flags: <defaults>
</compile_context>

<pallas_src>
import functools

import jax
import jax.numpy as jnp
from jax.experimental import pallas as pl
from jax.experimental.pallas import tpu as pltpu

HIDDEN = 128
N_PAD = 128  # lane-dense padded action width


def _pgn_kernel(x_ref, p1_ref, p2_ref, o_ref, *, in_size, hidden):
    # ---- Layer 1 on the MXU: (tb, K) @ (K, 128) + bias row (folded in p1) ----
    x = x_ref[...]
    h = jnp.dot(x, p1_ref[0:in_size, :], preferred_element_type=jnp.float32)
    h = jnp.maximum(h + p1_ref[in_size:in_size + 1, :], 0.0)   # bias + ReLU

    # ---- Layer 2 on the MXU: (tb, 128) @ (128, 128) + bias row (folded in p2) ----
    o = jnp.dot(h, p2_ref[0:hidden, :], preferred_element_type=jnp.float32)
    o_ref[...] = (o + p2_ref[hidden:hidden + 1, :]).astype(o_ref.dtype)


@functools.partial(jax.jit, static_argnames=("n_actions", "batch_tile"))
def pgn_forward(x, p1, p2, *, n_actions, batch_tile=128):
    batch, in_size = x.shape
    hidden = p1.shape[1]
    n_pad = p2.shape[1]

    # Pick a sublane-aligned batch tile and pad the batch up to a multiple of it.
    tb = min(batch_tile, max(8, ((batch + 7) // 8) * 8))
    padded = ((batch + tb - 1) // tb) * tb
    if padded != batch:
        x = jnp.pad(x, ((0, padded - batch), (0, 0)))
    grid = (padded // tb,)

    kernel = functools.partial(_pgn_kernel, in_size=in_size, hidden=hidden)
    out = pl.pallas_call(
        kernel,
        out_shape=jax.ShapeDtypeStruct((padded, n_pad), jnp.float32),
        grid=grid,
        in_specs=[
            pl.BlockSpec((tb, in_size), lambda i: (i, 0)),
            # constant block index => weights fetched once, VMEM-resident
            pl.BlockSpec((p1.shape[0], hidden), lambda i: (0, 0)),
            pl.BlockSpec((p2.shape[0], n_pad), lambda i: (0, 0)),
        ],
        out_specs=pl.BlockSpec((tb, n_pad), lambda i: (i, 0)),
        compiler_params=pltpu.CompilerParams(
            dimension_semantics=("parallel",)),  # v7x: shard batch tiles over 2 TCs
    )(x, p1, p2)
    # Slice padded batch rows and zero-padded action lanes back (outside the kernel,
    # and always BEFORE any reduction over the action axis).
    return out[:batch, :n_actions]


def init_pgn_params(key, input_size, n_actions, hidden=HIDDEN):
    """Deterministic init mimicking torch.nn.Linear (uniform +-1/sqrt(fan_in))."""
    k1, k2, k3, k4 = jax.random.split(key, 4)
    bound1 = 1.0 / jnp.sqrt(jnp.float32(input_size))
    bound2 = 1.0 / jnp.sqrt(jnp.float32(hidden))
    # stored as (in, out) so the kernel computes x @ W (== torch x @ W.T)
    w1 = jax.random.uniform(k1, (input_size, hidden), jnp.float32, -bound1, bound1)
    b1 = jax.random.uniform(k2, (1, hidden), jnp.float32, -bound1, bound1)
    w2 = jax.random.uniform(k3, (hidden, n_actions), jnp.float32, -bound2, bound2)
    b2 = jax.random.uniform(k4, (1, n_actions), jnp.float32, -bound2, bound2)
    return w1, b1, w2, b2


def pack_pgn_params(w1, b1, w2, b2, *, n_pad=N_PAD):
    """Pack params into two lane-dense, sublane-aligned buffers (ONCE, outside kernel).

    p1: (8, 128)    rows 0..K-1 = w1, row K = b1, rest zero.
    p2: (136, 128)  rows 0..127 = w2 zero-padded to n_pad lanes, row 128 = b2, rest zero.
    """
    in_size, hidden = w1.shape
    n_actions = w2.shape[1]
    rows1 = ((in_size + 1 + 7) // 8) * 8
    p1 = jnp.zeros((rows1, hidden), jnp.float32)
    p1 = p1.at[:in_size, :].set(w1).at[in_size, :].set(b1.reshape(-1))
    rows2 = ((hidden + 1 + 7) // 8) * 8
    p2 = jnp.zeros((rows2, n_pad), jnp.float32)
    p2 = p2.at[:hidden, :n_actions].set(w2).at[hidden, :n_actions].set(b2.reshape(-1))
    return p1, p2


if __name__ == "__main__":
    # CartPole-v1: observation size 4, 2 discrete actions. Batched rollout states.
    input_size, n_actions, batch = 4, 2, 256

    key = jax.random.PRNGKey(0)
    kx, kp = jax.random.split(key)
    x = jax.random.normal(kx, (batch, input_size), jnp.float32)
    w1, b1, w2, b2 = init_pgn_params(kp, input_size, n_actions)
    p1, p2 = pack_pgn_params(w1, b1, w2, b2)      # packed once, device-resident

    out = pgn_forward(x, p1, p2, n_actions=n_actions, batch_tile=128)
    jax.block_until_ready(out)

    # cross-check against plain JAX reference (original torch semantics)
    ref = jnp.maximum(x @ w1 + b1, 0.0) @ w2 + b2
    assert out.shape == (batch, n_actions)
    assert jnp.allclose(out, ref, atol=1e-5, rtol=1e-5)

    print("KERNEL_OK")
</pallas_src>

<mosaic_0001>
module attributes {stable_mosaic.version = 11 : i64} {
  func.func @_pgn_kernel(%arg0: i32, %arg1: memref<128x4xf32, #tpu.memory_space<vmem>>, %arg2: memref<8x128xf32, #tpu.memory_space<vmem>>, %arg3: memref<136x128xf32, #tpu.memory_space<vmem>>, %arg4: memref<128x128xf32, #tpu.memory_space<vmem>>) attributes {dimension_semantics = [#tpu.dimension_semantics<parallel>], iteration_bounds = array<i64: 2>, scalar_prefetch = 0 : i64, scratch_operands = 0 : i64, tpu.core_type = #tpu.core_type<tc>, window_params = [{transform_indices = @transform_0, window_bounds = array<i64: 128, 4>}, {pipeline_mode = #tpu.pipeline_mode<synchronous>, transform_indices = @transform_1, window_bounds = array<i64: 8, 128>}, {pipeline_mode = #tpu.pipeline_mode<synchronous>, transform_indices = @transform_2, window_bounds = array<i64: 136, 128>}, {transform_indices = @transform_3, window_bounds = array<i64: 128, 128>}]} {
    %c0 = arith.constant 0 : index
    %c0_0 = arith.constant 0 : index
    %0 = vector.load %arg1[%c0, %c0_0] : memref<128x4xf32, #tpu.memory_space<vmem>>, vector<128x4xf32>
    %c0_1 = arith.constant 0 : index
    %c0_2 = arith.constant 0 : index
    %1 = vector.load %arg2[%c0_1, %c0_2] : memref<8x128xf32, #tpu.memory_space<vmem>>, vector<4x128xf32>
    %cst = arith.constant dense<0.000000e+00> : vector<128x128xf32>
    %2 = tpu.matmul %0, %1, %cst {dimension_numbers = #tpu.dot_dimension_numbers<[1], [0], [0], [1], [0, 0, 1, 1], [], []>} : vector<128x4xf32>, vector<4x128xf32>, vector<128x128xf32> -> vector<128x128xf32>
    %c4 = arith.constant 4 : index
    %c0_3 = arith.constant 0 : index
    %3 = vector.load %arg2[%c4, %c0_3] : memref<8x128xf32, #tpu.memory_space<vmem>>, vector<1x128xf32>
    %4 = vector.broadcast %3 : vector<1x128xf32> to vector<128x128xf32>
    %5 = arith.addf %2, %4 : vector<128x128xf32>
    %cst_4 = arith.constant 0.000000e+00 : f32
    %6 = vector.broadcast %cst_4 : f32 to vector<128x128xf32>
    %7 = arith.maximumf %5, %6 : vector<128x128xf32>
    %c0_5 = arith.constant 0 : index
    %c0_6 = arith.constant 0 : index
    %8 = vector.load %arg3[%c0_5, %c0_6] : memref<136x128xf32, #tpu.memory_space<vmem>>, vector<128x128xf32>
    %cst_7 = arith.constant dense<0.000000e+00> : vector<128x128xf32>
    %9 = tpu.matmul %7, %8, %cst_7 {dimension_numbers = #tpu.dot_dimension_numbers<[1], [0], [0], [1], [0, 0, 1, 1], [], []>} : vector<128x128xf32>, vector<128x128xf32>, vector<128x128xf32> -> vector<128x128xf32>
    %c128 = arith.constant 128 : index
    %c0_8 = arith.constant 0 : index
    %10 = vector.load %arg3[%c128, %c0_8] : memref<136x128xf32, #tpu.memory_space<vmem>>, vector<1x128xf32>
    %11 = vector.broadcast %10 : vector<1x128xf32> to vector<128x128xf32>
    %12 = arith.addf %9, %11 : vector<128x128xf32>
    %c0_9 = arith.constant 0 : index
    %c0_10 = arith.constant 0 : index
    %13 = vector.load %arg4[%c0_9, %c0_10] : memref<128x128xf32, #tpu.memory_space<vmem>>, vector<128x128xf32>
    tpu.vector_store %arg4[%c0_9, %c0_10], %12 {strides = array<i32>} : memref<128x128xf32, #tpu.memory_space<vmem>>, vector<128x128xf32>,
    return
  }
  func.func @transform_0(%arg0: i32) -> (i32, i32) {
    %c0_i32 = arith.constant 0 : i32
    %c0_i32_0 = arith.constant 0 : i32
    return %arg0, %c0_i32 : i32, i32
  }
  func.func @transform_1(%arg0: i32) -> (i32, i32) {
    %c0_i32 = arith.constant 0 : i32
    %c0_i32_0 = arith.constant 0 : i32
    %c0_i32_1 = arith.constant 0 : i32
    return %c0_i32, %c0_i32_0 : i32, i32
  }
  func.func @transform_2(%arg0: i32) -> (i32, i32) {
    %c0_i32 = arith.constant 0 : i32
    %c0_i32_0 = arith.constant 0 : i32
    %c0_i32_1 = arith.constant 0 : i32
    return %c0_i32, %c0_i32_0 : i32, i32
  }
  func.func @transform_3(%arg0: i32) -> (i32, i32) {
    %c0_i32 = arith.constant 0 : i32
    %c0_i32_0 = arith.constant 0 : i32
    return %arg0, %c0_i32 : i32, i32
  }
}

</mosaic_0001>

<bundles_post_ra>
// kernel: pgn_forward.1
= control target key start
LH: loop header
LB: loop body
LE: loop exit
PB: predicated region body
PF: predicated region fallthrough
CT: control target
= control target key end

     0   :  { %s893_s12 = smov 0   ;;  %s1026_s0 = inlined_call_operand.vmem [shape: f32[256,4], index: 0, kind: input, shape index: {}]   ;;  %s1027_s1 = inlined_call_operand.vmem [shape: f32[8,128], index: 1, kind: input, shape index: {}]   ;;  %s1028_s2 = inlined_call_operand.vmem [shape: f32[136,128], index: 2, kind: input, shape index: {}]   ;;  %s1029_s3 = inlined_call_operand.vmem [shape: f32[256,128], index: 3, kind: output, shape index: {}]  }
   0x1 LB: > { %s648_s13 = sadd.s32 4294967295, %s871_s12   ;;  %p652_p0 = scmp.ge.s32.totalorder %s871_s12, 1  ;;  %s871_s12 = sphi %s893_s12, %s13_s12  }
   0x2   : > { %p138_p1 = scmp.lt.s32.totalorder %s871_s12, 3 }
   0x4   : > { %p139_p2 = pnand %p652_p0, %p138_p1 }
   0x5   : > { %v190_v0 = vld [vmem:[%s1027_s1] sm:$0xf] (!%p139_p2)  ;;  %vm245_vm0 = vcmask (!%p139_p2), 1043456   ;;  %s653_s16 = sshll.u32 (!%p139_p2), %s648_s13, 4  ;;  %v411_v2 = vld [vmem:[%s1028_s2 + $0x8] sm:$0xff] (!%p139_p2)  ;;  %v412_v3 = vld [vmem:[%s1028_s2 + $0x10] sm:$0xff] (!%p139_p2) }
   0x6   : > { %142 = sbr.rel (%p139_p2) target bundleno = 480 (0x1e0), region = 32  ;;  %v410_v1 = vld [vmem:[%s1028_s2] sm:$0xff] (!%p139_p2)  ;;  %727 = vmatprep.subr.msk.mxu0 (!%p139_p2), %vm245_vm0, %v190_v0  ;;  %p163_p3 = scmp.lt.s32.totalorder (!%p139_p2), %s653_s16, 31  ;;  %v413_v4 = vld [vmem:[%s1028_s2 + $0x18] sm:$0xff] (!%p139_p2)  ;;  %vm196_vm1 = vcmask (!%p139_p2), 31744   ;;  %v415_v8 = vld [vmem:[%s1028_s2 + $0x28] sm:$0xff] (!%p139_p2) }
   0x7   : > { %728 = vmatpush3.msk.msra.mxu0 (!%p139_p2), %vm245_vm0, %v190_v0  ;;  %v809_v5 = vpack.c.bf16 (!%p139_p2), %v411_v2, %v410_v1  ;;  %v813_v6 = vpack.c.bf16 (!%p139_p2), %v413_v4, %v412_v3  ;;  %v414_v7 = vld [vmem:[%s1028_s2 + $0x20] sm:$0xff] (!%p139_p2)  ;;  %v416_v14 = vld [vmem:[%s1028_s2 + $0x30] sm:$0xff] (!%p139_p2)  ;;  %v417_v15 = vld [vmem:[%s1028_s2 + $0x38] sm:$0xff] (!%p139_p2) }
   0x8   : > { %v817_v12 = vpack.c.bf16 (!%p139_p2), %v415_v8, %v414_v7  ;;  %v821_v17 = vpack.c.bf16 (!%p139_p2), %v417_v15, %v416_v14  ;;  %v418_v19 = vld [vmem:[%s1028_s2 + $0x40] sm:$0xff] (!%p139_p2)  ;;  %v419_v20 = vld [vmem:[%s1028_s2 + $0x48] sm:$0xff] (!%p139_p2)  ;;  %v420_v24 = vld [vmem:[%s1028_s2 + $0x50] sm:$0xff] (!%p139_p2) }
   0x9   : > { %810 = vmatprep.subr.bf16.mxu0 (!%p139_p2), %v809_v5  ;;  %841 = vmatprep.subr.bf16.mxu1 (!%p139_p2), %v809_v5  ;;  %v825_v22 = vpack.c.bf16 (!%p139_p2), %v419_v20, %v418_v19  ;;  %v421_v25 = vld [vmem:[%s1028_s2 + $0x58] sm:$0xff] (!%p139_p2)  ;;  %v422_v29 = vld [vmem:[%s1028_s2 + $0x60] sm:$0xff] (!%p139_p2)  ;;  %v423_v30 = vld [vmem:[%s1028_s2 + $0x68] sm:$0xff] (!%p139_p2) }
   0xa   : > { %849 = vmatpush3.bf16.msra.mxu1 (!%p139_p2), %v809_v5  ;;  %v829_v27 = vpack.c.bf16 (!%p139_p2), %v421_v25, %v420_v24  ;;  %v833_v32 = vpack.c.bf16 (!%p139_p2), %v423_v30, %v422_v29  ;;  %v424_v38 = vld [vmem:[%s1028_s2 + $0x70] sm:$0xff] (!%p139_p2)  ;;  %v425_v39 = vld [vmem:[%s1028_s2 + $0x78] sm:$0xff] (!%p139_p2)  ;;  %v657_v41 = vld [vmem:[%s1027_s1 + $0x4] ss:$0 sm:$0xff] (!%p139_p2) }
   0xb   : > { %842 = vmatprep.subr.bf16.mxu1 (!%p139_p2), %v813_v6  ;;  %v837_v40 = vpack.c.bf16 (!%p139_p2), %v425_v39, %v424_v38 }
   0xd   : > { %s1031_s16 = smov (!%p163_p3, %s653_s16), 31 }
   0xe   : > { %s654_s25 = sshll.u32 %s1031_s16, 3  ;;  %850 = vmatpush3.bf16.msra.mxu1 %v813_v6 }
   0xf   : > { %s924_s28 = scalar_lea.vmem %s1026_s0, %s654_s25  ;;  %843 = vmatprep.subr.bf16.mxu1 %v817_v12  ;;  %s1005_s8 = scalar_lea.vmem %s1029_s3, %s654_s25 }
  0x10   : > { %v174_v9 = vld [vmem:[%s924_s28] sm:$0xff]  ;;  %v175_v10 = vld [vmem:[%s924_s28 + $0x8] sm:$0xff]  ;;  %v176_v11 = vld [vmem:[%s924_s28 + $0x10] sm:$0xff] }
  0x11   : > { %729 = vmatprep.mubr.msk.f32.mxu0 %vm196_vm1, %v174_v9  ;;  %v177_v13 = vld [vmem:[%s924_s28 + $0x18] sm:$0xff]  ;;  %v178_v16 = vld [vmem:[%s924_s28 + $0x20] sm:$0xff]  ;;  %v179_v18 = vld [vmem:[%s924_s28 + $0x28] sm:$0xff] }
  0x12   : > { %730 = vmatmul.mubr.msk.f32.vlgmr.msra.gmra.mrb[0].mxu0 %vm196_vm1, %v175_v10  ;;  %851 = vmatpush3.bf16.msra.mxu1 %v817_v12  ;;  %v180_v21 = vld [vmem:[%s924_s28 + $0x30] sm:$0xff]  ;;  %v181_v23 = vld [vmem:[%s924_s28 + $0x38] sm:$0xff]  ;;  %v182_v26 = vld [vmem:[%s924_s28 + $0x40] sm:$0xff] }
  0x13   : > { %732 = vmatprep.mubr.msk.f32.mxu0 %vm196_vm1, %v176_v11  ;;  %812 = vmatpush3.bf16.msra.mxu0 %v809_v5  ;;  %v183_v28 = vld [vmem:[%s924_s28 + $0x48] sm:$0xff]  ;;  %v184_v31 = vld [vmem:[%s924_s28 + $0x50] sm:$0xff]  ;;  %v185_v33 = vld [vmem:[%s924_s28 + $0x58] sm:$0xff] }
  0x14   : > { %814 = vmatprep.subr.bf16.mxu0 %v813_v6  ;;  %844 = vmatprep.subr.bf16.mxu1 %v821_v17  ;;  %v186_v34 = vld [vmem:[%s924_s28 + $0x60] sm:$0xff]  ;;  %v187_v35 = vld [vmem:[%s924_s28 + $0x68] sm:$0xff]  ;;  %v188_v36 = vld [vmem:[%s924_s28 + $0x70] sm:$0xff] }
  0x15   : > { %v189_v37 = vld [vmem:[%s924_s28 + $0x78] sm:$0xff] }
  0x16   : > { %733 = vmatmul.mubr.msk.f32.gmra.mrb[2].mxu0 %vm196_vm1, %v177_v13  ;;  %852 = vmatpush3.bf16.msra.mxu1 %v821_v17 }
  0x17   : > { %735 = vmatprep.mubr.msk.f32.mxu0 %vm196_vm1, %v178_v16  ;;  %816 = vmatpush3.bf16.msra.mxu0 %v813_v6 }
  0x18   : > { %818 = vmatprep.subr.bf16.mxu0 %v817_v12  ;;  %845 = vmatprep.subr.bf16.mxu1 %v825_v22 }
  0x1a   : > { %736 = vmatmul.mubr.msk.f32.gmra.mrb[4].mxu0 %vm196_vm1, %v179_v18  ;;  %853 = vmatpush3.bf16.msra.mxu1 %v825_v22 }
  0x1b   : > { %738 = vmatprep.mubr.msk.f32.mxu0 %vm196_vm1, %v180_v21  ;;  %820 = vmatpush3.bf16.msra.mxu0 %v817_v12 }
  0x1c   : > { %822 = vmatprep.subr.bf16.mxu0 %v821_v17  ;;  %846 = vmatprep.subr.bf16.mxu1 %v829_v27 }
  0x1e   : > { %739 = vmatmul.mubr.msk.f32.gmra.mrb[6].mxu0 %vm196_vm1, %v181_v23  ;;  %854 = vmatpush3.bf16.msra.mxu1 %v829_v27 }
  0x1f   : > { %741 = vmatprep.mubr.msk.f32.mxu0 %vm196_vm1, %v182_v26  ;;  %824 = vmatpush3.bf16.msra.mxu0 %v821_v17  ;;  %v675_v26 = vld [vmem:[%s1028_s2 + $0x80] ss:$0 sm:$0xff] }
  0x20   : > { %826 = vmatprep.subr.bf16.mxu0 %v825_v22  ;;  %847 = vmatprep.subr.bf16.mxu1 %v833_v32 }
  0x22   : > { %742 = vmatmul.mubr.msk.f32.gmra.mrb[8].mxu0 %vm196_vm1, %v183_v28  ;;  %855 = vmatpush3.bf16.msra.mxu1 %v833_v32 }
  0x23   : > { %744 = vmatprep.mubr.msk.f32.mxu0 %vm196_vm1, %v184_v31  ;;  %828 = vmatpush3.bf16.msra.mxu0 %v825_v22 }
  0x24   : > { %830 = vmatprep.subr.bf16.mxu0 %v829_v27  ;;  %848 = vmatprep.subr.bf16.mxu1 %v837_v40 }
  0x26   : > { %745 = vmatmul.mubr.msk.f32.gmra.mrb[10].mxu0 %vm196_vm1, %v185_v33  ;;  %856 = vmatpush3.bf16.msra.mxu1 %v837_v40 }
  0x27   : > { %747 = vmatprep.mubr.msk.f32.mxu0 %vm196_vm1, %v186_v34  ;;  %832 = vmatpush3.bf16.msra.mxu0 %v829_v27 }
  0x28   : > { %834 = vmatprep.subr.bf16.mxu0 %v833_v32 }
  0x2a   : > { %748 = vmatmul.mubr.msk.f32.gmra.mrb[12].mxu0 %vm196_vm1, %v187_v35 }
  0x2b   : > { %750 = vmatprep.mubr.msk.f32.mxu0 %vm196_vm1, %v188_v36  ;;  %836 = vmatpush3.bf16.msra.mxu0 %v833_v32 }
  0x2c   : > { %838 = vmatprep.subr.bf16.mxu0 %v837_v40 }
  0x2e   : > { %751 = vmatmul.mubr.msk.f32.gmra.mrb[14].mxu0 %vm196_vm1, %v189_v37 }
  0x2f   : > { %840 = vmatpush3.bf16.msra.mxu0 %v837_v40 }
  0xe5   : > { %v731_v42 = vpop.f32.mrb[0].mxu0 }
  0xe6   : > { %v321_v43 = vadd.f32 %v731_v42, %v657_v41  ;;  %v315_v44 = vpop.f32.mrb[1].mxu0 }
  0xe7   : > { %v316_v45 = vadd.f32 %v657_v41, %v315_v44 }
  0xe8   : > { %v395_v48 = vmax.f32 %v321_v43, 0.0 }
  0xe9   : > { %v394_v46 = vmax.f32 %v316_v45, 0.0  ;;  %v734_v47 = vpop.f32.mrb[2].mxu0 }
  0xea   : > { %v331_v49 = vadd.f32 %v734_v47, %v657_v41  ;;  %v325_v50 = vpop.f32.mrb[3].mxu0 }
  0xeb   : > { %v326_v51 = vadd.f32 %v657_v41, %v325_v50  ;;  %785 = vmatprep.mubr.f32.mxu0 %v394_v46 }
  0xec   : > { %786 = vmatmul.mubr.f32.vlgmr.msra.gmra.mrb[16].mxu0 %v395_v48  ;;  %v397_v54 = vmax.f32 %v331_v49, 0.0 }
  0xed   : > { %v396_v52 = vmax.f32 %v326_v51, 0.0  ;;  %v737_v53 = vpop.f32.mrb[4].mxu0 }
  0xee   : > { %v341_v55 = vadd.f32 %v737_v53, %v657_v41  ;;  %v335_v56 = vpop.f32.mrb[5].mxu0 }
  0xef   : > { %v336_v57 = vadd.f32 %v657_v41, %v335_v56  ;;  %788 = vmatprep.mubr.f32.mxu0 %v396_v52 }
  0xf0   : > { %789 = vmatmul.mubr.f32.gmra.mrb[18].mxu0 %v397_v54  ;;  %v399_v60 = vmax.f32 %v341_v55, 0.0 }
  0xf1   : > { %v398_v58 = vmax.f32 %v336_v57, 0.0  ;;  %v740_v59 = vpop.f32.mrb[6].mxu0 }
  0xf2   : > { %v351_v61 = vadd.f32 %v740_v59, %v657_v41  ;;  %v345_v62 = vpop.f32.mrb[7].mxu0 }
  0xf3   : > { %791 = vmatprep.mubr.f32.mxu0 %v398_v58  ;;  %v346_v63 = vadd.f32 %v657_v41, %v345_v62 }
  0xf4   : > { %792 = vmatmul.mubr.f32.gmra.mrb[20].mxu0 %v399_v60  ;;  %v401_v2 = vmax.f32 %v351_v61, 0.0 }
  0xf5   : > { %v743_v0 = vpop.f32.mrb[8].mxu0  ;;  %v400_v1 = vmax.f32 %v346_v63, 0.0 }
  0xf6   : > { %v361_v3 = vadd.f32 %v743_v0, %v657_v41  ;;  %v355_v4 = vpop.f32.mrb[9].mxu0 }
  0xf7   : > { %v356_v5 = vadd.f32 %v657_v41, %v355_v4  ;;  %794 = vmatprep.mubr.f32.mxu1 %v400_v1 }
  0xf8   : > { %795 = vmatmul.mubr.f32.vlgmr.msra.gmra.mrb[0].mxu1 %v401_v2  ;;  %v403_v8 = vmax.f32 %v361_v3, 0.0 }
  0xf9   : > { %v402_v6 = vmax.f32 %v356_v5, 0.0  ;;  %v746_v7 = vpop.f32.mrb[10].mxu0 }
  0xfa   : > { %v371_v9 = vadd.f32 %v746_v7, %v657_v41  ;;  %v365_v10 = vpop.f32.mrb[11].mxu0 }
  0xfb   : > { %v366_v11 = vadd.f32 %v657_v41, %v365_v10  ;;  %797 = vmatprep.mubr.f32.mxu1 %v402_v6 }
  0xfc   : > { %798 = vmatmul.mubr.f32.gmra.mrb[2].mxu1 %v403_v8  ;;  %v405_v14 = vmax.f32 %v371_v9, 0.0 }
  0xfd   : > { %v404_v12 = vmax.f32 %v366_v11, 0.0  ;;  %v749_v13 = vpop.f32.mrb[12].mxu0 }
  0xfe   : > { %v381_v15 = vadd.f32 %v749_v13, %v657_v41  ;;  %v375_v16 = vpop.f32.mrb[13].mxu0 }
  0xff   : > { %v376_v17 = vadd.f32 %v657_v41, %v375_v16  ;;  %800 = vmatprep.mubr.f32.mxu1 %v404_v12 }
 0x100   : > { %801 = vmatmul.mubr.f32.gmra.mrb[4].mxu1 %v405_v14  ;;  %v407_v20 = vmax.f32 %v381_v15, 0.0 }
 0x101   : > { %v406_v18 = vmax.f32 %v376_v17, 0.0  ;;  %v752_v19 = vpop.f32.mrb[14].mxu0 }
 0x102   : > { %v391_v21 = vadd.f32 %v752_v19, %v657_v41  ;;  %v385_v22 = vpop.f32.mrb[15].mxu0 }
 0x103   : > { %v386_v23 = vadd.f32 %v657_v41, %v385_v22  ;;  %803 = vmatprep.mubr.f32.mxu1 %v406_v18 }
 0x104   : > { %804 = vmatmul.mubr.f32.gmra.mrb[6].mxu1 %v407_v20  ;;  %v409_v25 = vmax.f32 %v391_v21, 0.0 }
 0x105   : > { %v408_v24 = vmax.f32 %v386_v23, 0.0 }
 0x107   : > { %806 = vmatprep.mubr.f32.mxu1 %v408_v24 }
 0x108   : > { %807 = vmatmul.mubr.f32.gmra.mrb[8].mxu1 %v409_v25 }
 0x1bf   : > { %v787_v27 = vpop.f32.mrb[16].mxu0 }
 0x1c0   : > { %v503_v28 = vadd.f32 %v787_v27, %v675_v26  ;;  %v497_v29 = vpop.f32.mrb[17].mxu0 }
 0x1c1   : > { %v498_v30 = vadd.f32 %v675_v26, %v497_v29 }
 0x1c2   : > { %577 = vst [vmem:[%s1005_s8 + $0x8] sm:$0xff] %v503_v28 }
 0x1c3   : > { %576 = vst [vmem:[%s1005_s8] sm:$0xff] %v498_v30  ;;  %v790_v31 = vpop.f32.mrb[18].mxu0 }
 0x1c4   : > { %v513_v32 = vadd.f32 %v790_v31, %v675_v26  ;;  %v507_v33 = vpop.f32.mrb[19].mxu0 }
 0x1c5   : > { %v508_v34 = vadd.f32 %v675_v26, %v507_v33 }
 0x1c6   : > { %579 = vst [vmem:[%s1005_s8 + $0x18] sm:$0xff] %v513_v32 }
 0x1c7   : > { %578 = vst [vmem:[%s1005_s8 + $0x10] sm:$0xff] %v508_v34  ;;  %v793_v35 = vpop.f32.mrb[20].mxu0 }
 0x1c8   : > { %v523_v36 = vadd.f32 %v793_v35, %v675_v26  ;;  %v517_v37 = vpop.f32.mrb[21].mxu0 }
 0x1c9   : > { %v518_v38 = vadd.f32 %v675_v26, %v517_v37 }
 0x1ca   : > { %581 = vst [vmem:[%s1005_s8 + $0x28] sm:$0xff] %v523_v36 }
 0x1cb   : > { %580 = vst [vmem:[%s1005_s8 + $0x20] sm:$0xff] %v518_v38  ;;  %v796_v39 = vpop.f32.mrb[0].mxu1 }
 0x1cc   : > { %v533_v40 = vadd.f32 %v796_v39, %v675_v26  ;;  %v527_v41 = vpop.f32.mrb[1].mxu1 }
 0x1cd   : > { %v528_v42 = vadd.f32 %v675_v26, %v527_v41 }
 0x1ce   : > { %583 = vst [vmem:[%s1005_s8 + $0x38] sm:$0xff] %v533_v40 }
 0x1cf   : > { %582 = vst [vmem:[%s1005_s8 + $0x30] sm:$0xff] %v528_v42  ;;  %v799_v43 = vpop.f32.mrb[2].mxu1 }
 0x1d0   : > { %v543_v44 = vadd.f32 %v799_v43, %v675_v26  ;;  %v537_v45 = vpop.f32.mrb[3].mxu1 }
 0x1d1   : > { %v538_v46 = vadd.f32 %v675_v26, %v537_v45 }
 0x1d2   : > { %585 = vst [vmem:[%s1005_s8 + $0x48] sm:$0xff] %v543_v44 }
 0x1d3   : > { %584 = vst [vmem:[%s1005_s8 + $0x40] sm:$0xff] %v538_v46  ;;  %v802_v47 = vpop.f32.mrb[4].mxu1 }
 0x1d4   : > { %v553_v48 = vadd.f32 %v802_v47, %v675_v26  ;;  %v547_v49 = vpop.f32.mrb[5].mxu1 }
 0x1d5   : > { %v548_v50 = vadd.f32 %v675_v26, %v547_v49 }
 0x1d6   : > { %587 = vst [vmem:[%s1005_s8 + $0x58] sm:$0xff] %v553_v48 }
 0x1d7   : > { %586 = vst [vmem:[%s1005_s8 + $0x50] sm:$0xff] %v548_v50  ;;  %v805_v51 = vpop.f32.mrb[6].mxu1 }
 0x1d8   : > { %v563_v52 = vadd.f32 %v805_v51, %v675_v26  ;;  %v557_v53 = vpop.f32.mrb[7].mxu1 }
 0x1d9   : > { %v558_v54 = vadd.f32 %v675_v26, %v557_v53 }
 0x1da   : > { %589 = vst [vmem:[%s1005_s8 + $0x68] sm:$0xff] %v563_v52 }
 0x1db   : > { %588 = vst [vmem:[%s1005_s8 + $0x60] sm:$0xff] %v558_v54  ;;  %v808_v55 = vpop.f32.mrb[8].mxu1 }
 0x1dc   : > { %v573_v56 = vadd.f32 %v808_v55, %v675_v26  ;;  %v567_v57 = vpop.f32.mrb[9].mxu1 }
 0x1dd   : > { %v568_v58 = vadd.f32 %v675_v26, %v567_v57 }
 0x1de   : > { %591 = vst [vmem:[%s1005_s8 + $0x78] sm:$0xff] %v573_v56 }
 0x1df   : > { %590 = vst [vmem:[%s1005_s8 + $0x70] sm:$0xff] %v568_v58 }
 0x1e0 PF: > { %s13_s12 = sadd.s32 1, %s871_s12  }
 0x1e1   : > { %p10_p4 = scmp.ge.s32.totalorder %s13_s12, 4  }
 0x1e3   :  { %12 = sbr.rel (!%p10_p4) target bundleno = 1 (0x1), region = 62 }

</bundles_post_ra>
